<compile_context>
chip_gen: v7x
topology: tpu7x:2x2x1
jax: 0.10.0
libtpu: 0.0.40
codegen_flags: <defaults>
</compile_context>

<pallas_src>
import functools

import jax
import jax.numpy as jnp
from jax.experimental import pallas as pl
from jax.experimental.pallas import tpu as pltpu


LANE = 128     # lane width (last-dim tiling unit)
SUBLANE = 8    # sublane width (second-to-last-dim tiling unit)

TK_MAX = 2048                          # max K tile for the (rare) K-tiled fallback
_RESIDENT_W_MAX_BYTES = 8 * 1024 * 1024   # per-buffer cap for the resident weight
_X_TILE_BUDGET_BYTES = 16 * 1024 * 1024   # double-buffered x tile budget


def _round_up(x: int, m: int) -> int:
    return ((x + m - 1) // m) * m


def _batch_tile(batch: int, k_extent: int, itemsize: int) -> int:
    """Pick a sublane-aligned batch tile bounded by the VMEM x-tile budget."""
    cap = _X_TILE_BUDGET_BYTES // (2 * max(k_extent, 1) * itemsize)
    cap = max(SUBLANE, (cap // SUBLANE) * SUBLANE)
    cap = min(cap, 1024)
    tm = min(cap, _round_up(batch, SUBLANE))
    # v7x has 2 TensorCores; give the "parallel" batch axis >= 2 tiles when possible.
    if pl.cdiv(batch, tm) == 1 and batch >= 2 * SUBLANE:
        tm = _round_up(pl.cdiv(batch, 2), SUBLANE)
    # cdiv-based sizing: bound per-tile batch padding to < 8 rows (no round-up blowup).
    nb = pl.cdiv(batch, tm)
    tm = _round_up(pl.cdiv(batch, nb), SUBLANE)
    return tm


# ---------------------------------------------------------------------------
# Kernels
# ---------------------------------------------------------------------------

def _linear_resident_kernel(x_ref, wt_ref, b_ref, o_ref):
    # x_ref : (TM, dim)   VMEM  current batch tile of flattened features
    # wt_ref: (dim, Lp)   VMEM  full transposed weight (resident, DMA'd once)
    # b_ref : (1, Lp) f32 VMEM  padded bias (resident)
    # o_ref : (TM, Lp)          output tile
    o_ref[...] = (
        jnp.dot(x_ref[...], wt_ref[...], preferred_element_type=jnp.float32)
        + b_ref[...]
    ).astype(o_ref.dtype)


def _linear_ktiled_kernel(x_ref, wt_ref, b_ref, o_ref, acc_ref):
    # Fallback for very wide features: K is tiled, f32 accumulator in VMEM.
    k = pl.program_id(1)

    @pl.when(k == 0)
    def _():
        acc_ref[...] = jnp.broadcast_to(b_ref[...], acc_ref.shape)

    acc_ref[...] += jnp.dot(
        x_ref[...], wt_ref[...], preferred_element_type=jnp.float32
    )

    @pl.when(k == pl.num_programs(1) - 1)
    def _():
        o_ref[...] = acc_ref[...].astype(o_ref.dtype)


# ---------------------------------------------------------------------------
# Host-side wrappers
# ---------------------------------------------------------------------------

def prepare_params(weight, bias):
    """Hoisted (call once): transpose weight, pad label dim to 128 lanes."""
    num_labels, dim = weight.shape
    l_pad = _round_up(num_labels, LANE)
    wt = jnp.pad(weight.T, ((0, 0), (0, l_pad - num_labels)))          # (dim, Lp)
    b2 = jnp.pad(bias.astype(jnp.float32), (0, l_pad - num_labels))
    b2 = b2.reshape(1, l_pad)                                          # (1, Lp) f32
    return wt, b2, num_labels


@functools.partial(jax.jit, static_argnames=("num_labels", "compute_dtype"))
def linear_classifier_forward(x, wt_pad, b_pad, num_labels, compute_dtype=None):
    """x: (B, ...) any trailing dims; wt_pad: (dim, Lp); b_pad: (1, Lp) f32."""
    B = x.shape[0]
    x2 = x.reshape(B, -1)                     # flatten (glue, plain JAX)
    out_dtype = x2.dtype
    dim = x2.shape[1]
    l_pad = wt_pad.shape[1]
    assert wt_pad.shape[0] == dim, "weight dim mismatch with flattened features"

    if compute_dtype is not None:
        # Optional bf16 streaming: halves the dominant HBM byte stream; the
        # matmul still accumulates in f32 and the bias-add is f32.
        x2 = x2.astype(compute_dtype)
        wt_pad = wt_pad.astype(compute_dtype)

    x_itemsize = jnp.dtype(x2.dtype).itemsize
    w_itemsize = jnp.dtype(wt_pad.dtype).itemsize
    o_itemsize = jnp.dtype(out_dtype).itemsize

    flops = 2 * B * dim * l_pad
    bytes_accessed = (
        x2.size * x_itemsize
        + wt_pad.size * w_itemsize
        + b_pad.size * 4
        + B * l_pad * o_itemsize
    )
    cost = pl.CostEstimate(
        flops=flops, transcendentals=0, bytes_accessed=bytes_accessed
    )

    # ----- fast path: weight fully VMEM-resident, single K step -----------
    if dim * l_pad * w_itemsize <= _RESIDENT_W_MAX_BYTES:
        TM = _batch_tile(B, dim, x_itemsize)
        grid_b = pl.cdiv(B, TM)

        out = pl.pallas_call(
            _linear_resident_kernel,
            out_shape=jax.ShapeDtypeStruct((B, l_pad), out_dtype),
            grid_spec=pl.GridSpec(
                grid=(grid_b,),
                in_specs=[
                    # x tile: full feature extent as the K block (legal even if
                    # dim is not a multiple of 128 since it equals the array dim).
                    pl.BlockSpec((TM, dim), lambda i: (i, 0)),
                    # whole transposed weight, resident across the batch grid
                    pl.BlockSpec((dim, l_pad), lambda i: (0, 0)),
                    # padded bias, resident
                    pl.BlockSpec((1, l_pad), lambda i: (0, 0)),
                ],
                out_specs=pl.BlockSpec((TM, l_pad), lambda i: (i, 0)),
            ),
            compiler_params=pltpu.CompilerParams(
                dimension_semantics=("parallel",),
                vmem_limit_bytes=48 << 20,
            ),
            cost_estimate=cost,
        )(x2, wt_pad, b_pad)
        return out[:, :num_labels]

    # ----- fallback: K-tiled reduction (weight too large to keep resident) ---
    d128 = _round_up(dim, LANE)
    nk = pl.cdiv(d128, TK_MAX)
    TK = _round_up(pl.cdiv(d128, nk), LANE)
    D_pad = nk * TK

    # Zero padding of the K axis is numerically inert (rare path only).
    x2p = jnp.pad(x2, ((0, 0), (0, D_pad - dim)))
    wtp = jnp.pad(wt_pad, ((0, D_pad - dim), (0, 0)))

    TM = _batch_tile(B, TK, x_itemsize)
    grid = (pl.cdiv(B, TM), nk)

    out = pl.pallas_call(
        _linear_ktiled_kernel,
        out_shape=jax.ShapeDtypeStruct((B, l_pad), out_dtype),
        grid_spec=pl.GridSpec(
            grid=grid,
            in_specs=[
                pl.BlockSpec((TM, TK), lambda i, k: (i, k)),      # x tile
                pl.BlockSpec((TK, l_pad), lambda i, k: (k, 0)),   # wt K tile
                pl.BlockSpec((1, l_pad), lambda i, k: (0, 0)),    # bias (resident)
            ],
            out_specs=pl.BlockSpec((TM, l_pad), lambda i, k: (i, 0)),
            scratch_shapes=[pltpu.VMEM((TM, l_pad), jnp.float32)],
        ),
        compiler_params=pltpu.CompilerParams(
            dimension_semantics=("parallel", "arbitrary"),
            vmem_limit_bytes=48 << 20,
        ),
        cost_estimate=cost,
    )(x2p, wtp, b_pad)
    return out[:, :num_labels]


def init_params(key, dim, num_labels=9, dtype=jnp.float32):
    # Matches: weight ~ N(0, 0.01), bias = 0
    (w_key,) = jax.random.split(key, 1)
    weight = (
        jax.random.normal(w_key, (num_labels, dim), dtype=jnp.float32) * 0.01
    ).astype(dtype)
    bias = jnp.zeros((num_labels,), dtype=dtype)
    return weight, bias


if __name__ == "__main__":
    key = jax.random.PRNGKey(0)
    k_x, k_p = jax.random.split(key)

    # Small shapes: batch=8, feature map flattening to dim=32 (i.e. (8, 2, 4, 4)).
    B, C, H, W = 8, 2, 4, 4
    dim = C * H * W
    num_labels = 9

    x = jax.random.normal(k_x, (B, C, H, W), dtype=jnp.float32)
    weight, bias = init_params(k_p, dim, num_labels)

    # Hoisted once: transpose + pad the weight/bias.
    wt_pad, b_pad, nl = prepare_params(weight, bias)

    y = linear_classifier_forward(x, wt_pad, b_pad, num_labels=nl)
    y = jax.block_until_ready(y)

    # Reference check in plain JAX
    y_ref = x.reshape(B, -1) @ weight.T + bias
    assert y.shape == (B, num_labels)
    assert jnp.allclose(y, y_ref, atol=1e-5, rtol=1e-5)

    print("KERNEL_OK")
</pallas_src>

<mosaic_0001>
module attributes {stable_mosaic.version = 11 : i64} {
  func.func @_linear_resident_kernel(%arg0: i32, %arg1: memref<8x32xf32, #tpu.memory_space<vmem>>, %arg2: memref<32x128xf32, #tpu.memory_space<vmem>>, %arg3: memref<1x128xf32, #tpu.memory_space<vmem>>, %arg4: memref<8x128xf32, #tpu.memory_space<vmem>>) attributes {dimension_semantics = [#tpu.dimension_semantics<parallel>], iteration_bounds = array<i64: 1>, scalar_prefetch = 0 : i64, scratch_operands = 0 : i64, tpu.core_type = #tpu.core_type<tc>, window_params = [{transform_indices = @transform_0, window_bounds = array<i64: 8, 32>}, {pipeline_mode = #tpu.pipeline_mode<synchronous>, transform_indices = @transform_1, window_bounds = array<i64: 32, 128>}, {pipeline_mode = #tpu.pipeline_mode<synchronous>, transform_indices = @transform_2, window_bounds = array<i64: 1, 128>}, {transform_indices = @transform_3, window_bounds = array<i64: 8, 128>}]} {
    %c0 = arith.constant 0 : index
    %c0_0 = arith.constant 0 : index
    %0 = vector.load %arg1[%c0, %c0_0] : memref<8x32xf32, #tpu.memory_space<vmem>>, vector<8x32xf32>
    %c0_1 = arith.constant 0 : index
    %c0_2 = arith.constant 0 : index
    %1 = vector.load %arg2[%c0_1, %c0_2] : memref<32x128xf32, #tpu.memory_space<vmem>>, vector<32x128xf32>
    %cst = arith.constant dense<0.000000e+00> : vector<8x128xf32>
    %2 = tpu.matmul %0, %1, %cst {dimension_numbers = #tpu.dot_dimension_numbers<[1], [0], [0], [1], [0, 0, 1, 1], [], []>} : vector<8x32xf32>, vector<32x128xf32>, vector<8x128xf32> -> vector<8x128xf32>
    %c0_3 = arith.constant 0 : index
    %c0_4 = arith.constant 0 : index
    %3 = vector.load %arg3[%c0_3, %c0_4] : memref<1x128xf32, #tpu.memory_space<vmem>>, vector<1x128xf32>
    %4 = vector.broadcast %3 : vector<1x128xf32> to vector<8x128xf32>
    %5 = arith.addf %2, %4 : vector<8x128xf32>
    %c0_5 = arith.constant 0 : index
    %c0_6 = arith.constant 0 : index
    %6 = vector.load %arg4[%c0_5, %c0_6] : memref<8x128xf32, #tpu.memory_space<vmem>>, vector<8x128xf32>
    tpu.vector_store %arg4[%c0_5, %c0_6], %5 {strides = array<i32>} : memref<8x128xf32, #tpu.memory_space<vmem>>, vector<8x128xf32>,
    return
  }
  func.func @transform_0(%arg0: i32) -> (i32, i32) {
    %c0_i32 = arith.constant 0 : i32
    %c0_i32_0 = arith.constant 0 : i32
    return %arg0, %c0_i32 : i32, i32
  }
  func.func @transform_1(%arg0: i32) -> (i32, i32) {
    %c0_i32 = arith.constant 0 : i32
    %c0_i32_0 = arith.constant 0 : i32
    %c0_i32_1 = arith.constant 0 : i32
    return %c0_i32, %c0_i32_0 : i32, i32
  }
  func.func @transform_2(%arg0: i32) -> (i32, i32) {
    %c0_i32 = arith.constant 0 : i32
    %c0_i32_0 = arith.constant 0 : i32
    %c0_i32_1 = arith.constant 0 : i32
    return %c0_i32, %c0_i32_0 : i32, i32
  }
  func.func @transform_3(%arg0: i32) -> (i32, i32) {
    %c0_i32 = arith.constant 0 : i32
    %c0_i32_0 = arith.constant 0 : i32
    return %arg0, %c0_i32 : i32, i32
  }
}

</mosaic_0001>

<bundles_post_ra>
// kernel: linear_classifier_forward.1
= control target key start
LH: loop header
LB: loop body
LE: loop exit
PB: predicated region body
PF: predicated region fallthrough
CT: control target
= control target key end

     0   :  { %v168_v3 = vmov 0.0|0.0   ;;  %vm169_vm0 = vmmov 0   ;;  %v170_v6 = vmov 0.0   ;;  %s222_s0 = inlined_call_operand.vmem [shape: f32[8,32], index: 0, kind: input, shape index: {}]   ;;  %s223_s1 = inlined_call_operand.vmem [shape: f32[32,128], index: 1, kind: input, shape index: {}]   ;;  %s224_s2 = inlined_call_operand.vmem [shape: f32[1,128], index: 2, kind: input, shape index: {}]   ;;  %s225_s3 = inlined_call_operand.hbm [shape: f32[8,128], index: 3, kind: output, shape index: {}]  }
   0x1   :  { %v16_v0 = vld [vmem:[%s223_s1] sm:$0xff]  ;;  %v17_v1 = vld [vmem:[%s223_s1 + $0x8] sm:$0xff]  ;;  %v18_v2 = vld [vmem:[%s223_s1 + $0x10] sm:$0xff]  ;;  %134 = vmatprep.subr.bf16.mxu0 %v168_v3  ;;  %131 = vmatprep.mubr.msk.f32.mxu0 %vm169_vm0, %v170_v6 }
   0x2   :  { %v135_v4 = vpack.c.bf16 %v17_v1, %v16_v0  ;;  %v19_v5 = vld [vmem:[%s223_s1 + $0x18] sm:$0xff] }
   0x3   :  { %8 = vsyncpa [#allocation3], 0  ;;  %v138_v7 = vpack.c.bf16 %v19_v5, %v18_v2  ;;  %v15_v8 = vld [vmem:[%s222_s0] sm:$0xff]  ;;  %vm27_vm1 = vcmask 261120   ;;  %s171_s24 = smov [#allocation2]  }
   0x4   :  { %136 = vmatpush3.bf16.msra.mxu0 %v135_v4  ;;  %v116_v9 = vld [vmem:[%s224_s2] ss:$0 sm:$0xff]  ;;  %s108_s1 = sshll.u32 %s171_s24, 4  ;;  %s109_s1 = int_to_ptr.vmem [resolvable:$true] %s108_s1 }
   0x5   :  { %137 = vmatprep.subr.bf16.mxu0 %v168_v3  ;;  %s144_s25 = scalar_lea.vmem %s109_s1, 128  ;;  %p149_p1 = scmp.lt.s32.totalorder %s109_s1, %s109_s1 }
   0x6   :  { %p145_p0 = scmp.ne.s32.totalorder %s109_s1, %s144_s25  ;;  %p150_p2 = scmp.lt.s32.totalorder %s144_s25, %s144_s25 }
   0x8   :  { %139 = vmatpush3.bf16.msra.mxu0 %v138_v7  ;;  %p151_p3 = por %p150_p2, %p149_p1 }
   0xa   :  { %p152_p4 = pnand %p151_p3, %p145_p0 }
   0xb   :  { %132 = vmatmul.mubr.msk.f32.vlgmr.msra.gmra.mrb[0].mxu0 %vm27_vm1, %v15_v8 }
  0xde   :  { %v97_v10 = vpop.f32.mrb[0].mxu0 }
  0xdf   :  { %v98_v11 = vadd.f32 %v116_v9, %v97_v10  ;;  %v133_v12 = vpop.f32.mrb[1].mxu0 }
  0xe1   :  { %101 = vst [vmem:[#allocation2] sm:$0xff] %v98_v11 }
  0xe2   :  { %155 = shalt.err (!%p152_p4)
}
  0xe3   :  { %s156_s27 = scalar_lea.hbm %s225_s3, 128 }
  0xe4   :  { %p157_p5 = scmp.ne.s32.totalorder %s225_s3, %s156_s27  ;;  %p160_p6 = scmp.lt.u32.totalorder %s156_s27, %s225_s3 }
  0xe6   :  { %p162_p7 = pnand %p160_p6, %p157_p5 }
  0xe8   :  { %165 = shalt.err (!%p162_p7)
}
  0xe9   :  { %111 = dma.vmem_to_hbm [thread:$0]  %s109_s1, 128, %s225_s3, [#allocation3]  }
  0xea   :  { %166 = dma.done.wait [#allocation3], 128  }
  0xeb   :  { %167 = vsyncadd [#allocation3], 4294967168 }
  0xec   :  { %115 = vsyncpa [#allocation3], 1 }

</bundles_post_ra>
